<compile_context>
chip_gen: v7x
topology: tpu7x:2x2x1
jax: 0.10.0
libtpu: 0.0.40
codegen_flags: <defaults>
</compile_context>

<pallas_src>
from functools import partial

import jax
import jax.numpy as jnp
from jax.experimental import pallas as pl
from jax.experimental.pallas import tpu as pltpu

LANES = 128                      # TPU vreg lane width
_TARGET_BLOCK_BYTES = 4 << 20    # ~4 MiB/tile -> 16 MiB double-buffered in+out
_FLOOR_BLOCK_BYTES = 256 << 10   # below ~256 KiB/tile the roofline fraction drops
_MIN_STEPS = 8                   # keep both v7x TCs pipelined (even count preferred)
_VMEM_LIMIT_BYTES = 32 << 20     # explicit scoped VMEM: safe on v5e/v6e/v7x


def _islrelu_kernel(x_ref, o_ref, *, alpha):
    # y = (x + alpha * (sqrt(1 + x^2) - 1)) / (1 + alpha), computed in f32.
    x = x_ref[...].astype(jnp.float32)
    y = (x + alpha * (jnp.sqrt(1.0 + x * x) - 1.0)) * (1.0 / (1.0 + alpha))
    o_ref[...] = y.astype(o_ref.dtype)


def _sublane_multiple(dtype):
    itemsize = jnp.dtype(dtype).itemsize
    if itemsize >= 4:
        return 8
    if itemsize == 2:
        return 16
    return 32


def _round_up(v, m):
    return ((v + m - 1) // m) * m


def _pick_width(total):
    # Widest lane-dense slab (multiple of 128) that tiles `total` exactly.
    for w in (1024, 512, 256, LANES):
        if total % w == 0:
            return w
    return LANES


def islrelu(x, slope=0.1):
    alpha = (1.0 - slope) / (1.0 + slope)
    orig_shape = x.shape
    orig_dtype = x.dtype
    itemsize = jnp.dtype(orig_dtype).itemsize
    sublane = _sublane_multiple(orig_dtype)
    total = x.size

    if total == 0:
        return x

    x_flat = jnp.ravel(x)
    if total % LANES == 0:
        padded_total = total
        needs_trim = False
    else:
        # Ragged fallback: one pad copy + one trim slice (~2x HBM traffic).
        padded_total = _round_up(total, LANES)
        x_flat = jnp.pad(x_flat, (0, padded_total - total))
        needs_trim = True

    width = _pick_width(padded_total)
    rows = padded_total // width
    x2d = x_flat.reshape(rows, width)  # metadata-only

    # --- Tile sizing: constant bytes per tile, dtype-aware sublane rounding ---
    row_bytes = width * itemsize
    cap_rows = max(sublane, (_TARGET_BLOCK_BYTES // row_bytes) // sublane * sublane)
    floor_rows = max(sublane, (_FLOOR_BLOCK_BYTES // row_bytes) // sublane * sublane)

    max_steps_by_floor = max(1, rows // floor_rows)   # more steps -> tiles < floor
    min_steps_by_cap = pl.cdiv(rows, cap_rows)        # fewer steps -> tiles > cap
    steps = max(min_steps_by_cap, min(_MIN_STEPS, max_steps_by_floor))
    if steps > 1 and steps % 2 == 1:
        steps += 1                                    # even split across 2 TCs
    block_rows = _round_up(pl.cdiv(rows, steps), sublane)
    if block_rows >= rows:
        block_rows = rows                             # block == full dims: always legal
    grid = (pl.cdiv(rows, block_rows),)               # partial last block is masked

    cost = pl.CostEstimate(
        flops=6 * padded_total,
        transcendentals=padded_total,
        bytes_accessed=2 * padded_total * itemsize,
    )

    out2d = pl.pallas_call(
        partial(_islrelu_kernel, alpha=alpha),
        out_shape=jax.ShapeDtypeStruct((rows, width), orig_dtype),
        grid=grid,
        in_specs=[pl.BlockSpec((block_rows, width), lambda i: (i, 0))],
        out_specs=pl.BlockSpec((block_rows, width), lambda i: (i, 0)),
        compiler_params=pltpu.CompilerParams(
            dimension_semantics=("parallel",),
            vmem_limit_bytes=_VMEM_LIMIT_BYTES,
        ),
        cost_estimate=cost,
    )(x2d)

    if needs_trim:
        return out2d.reshape(-1)[:total].reshape(orig_shape)
    return out2d.reshape(orig_shape)


def islrelu_reference(x, slope=0.1):
    alpha = (1.0 - slope) / (1.0 + slope)
    xf = x.astype(jnp.float32)
    y = (xf + alpha * (jnp.sqrt(1.0 + xf * xf) - 1.0)) / (1.0 + alpha)
    return y.astype(x.dtype)


if __name__ == "__main__":
    key = jax.random.PRNGKey(0)

    # Primary check: NCHW f32 activations (fast path, lane-dense W=1024 slab).
    x = jax.random.normal(key, (2, 4, 16, 16), dtype=jnp.float32)
    y = jax.block_until_ready(islrelu(x, slope=0.1))
    y_ref = islrelu_reference(x, slope=0.1)
    assert y.shape == x.shape and y.dtype == x.dtype
    assert jnp.allclose(y, y_ref, atol=1e-6, rtol=1e-6)

    # Multi-step grid with a partial (masked) boundary block along rows.
    x1 = jax.random.normal(jax.random.PRNGKey(0), (1111, 128), dtype=jnp.float32)
    y1 = jax.block_until_ready(islrelu(x1, slope=0.1))
    assert y1.shape == x1.shape and y1.dtype == x1.dtype
    assert jnp.allclose(y1, islrelu_reference(x1, slope=0.1), atol=1e-6, rtol=1e-6)

    # Ragged-shape check (size not a multiple of 128: pad + trim fallback).
    x2 = jax.random.normal(jax.random.PRNGKey(0), (3, 5, 7, 11), dtype=jnp.float32)
    y2 = jax.block_until_ready(islrelu(x2, slope=0.1))
    assert y2.shape == x2.shape and y2.dtype == x2.dtype
    assert jnp.allclose(y2, islrelu_reference(x2, slope=0.1), atol=1e-6, rtol=1e-6)

    # bf16 I/O check (halved HBM traffic; compute upcast to f32 in-kernel).
    x3 = jax.random.normal(key, (2, 4, 16, 16), dtype=jnp.bfloat16)
    y3 = jax.block_until_ready(islrelu(x3, slope=0.1))
    assert y3.shape == x3.shape and y3.dtype == x3.dtype
    assert jnp.allclose(
        y3.astype(jnp.float32),
        islrelu_reference(x3, slope=0.1).astype(jnp.float32),
        atol=2e-2, rtol=2e-2,
    )

    print("KERNEL_OK")
</pallas_src>

<mosaic_0001>
module attributes {stable_mosaic.version = 11 : i64} {
  func.func @_islrelu_kernel(%arg0: i32, %arg1: memref<2x1024xf32, #tpu.memory_space<vmem>>, %arg2: memref<2x1024xf32, #tpu.memory_space<vmem>>) attributes {dimension_semantics = [#tpu.dimension_semantics<parallel>], iteration_bounds = array<i64: 1>, scalar_prefetch = 0 : i64, scratch_operands = 0 : i64, tpu.core_type = #tpu.core_type<tc>, window_params = [{transform_indices = @transform_0, window_bounds = array<i64: 2, 1024>}, {transform_indices = @transform_1, window_bounds = array<i64: 2, 1024>}]} {
    %c0 = arith.constant 0 : index
    %c0_0 = arith.constant 0 : index
    %0 = vector.load %arg1[%c0, %c0_0] : memref<2x1024xf32, #tpu.memory_space<vmem>>, vector<2x1024xf32>
    %1 = arith.mulf %0, %0 : vector<2x1024xf32>
    %cst = arith.constant 1.000000e+00 : f32
    %2 = vector.broadcast %cst : f32 to vector<2x1024xf32>
    %3 = arith.addf %2, %1 : vector<2x1024xf32>
    %4 = math.sqrt %3 : vector<2x1024xf32>
    %cst_1 = arith.constant 1.000000e+00 : f32
    %5 = vector.broadcast %cst_1 : f32 to vector<2x1024xf32>
    %6 = arith.subf %4, %5 : vector<2x1024xf32>
    %cst_2 = arith.constant 0.818181812 : f32
    %7 = vector.broadcast %cst_2 : f32 to vector<2x1024xf32>
    %8 = arith.mulf %7, %6 : vector<2x1024xf32>
    %9 = arith.addf %0, %8 : vector<2x1024xf32>
    %cst_3 = arith.constant 5.500000e-01 : f32
    %10 = vector.broadcast %cst_3 : f32 to vector<2x1024xf32>
    %11 = arith.mulf %9, %10 : vector<2x1024xf32>
    %c0_4 = arith.constant 0 : index
    %c0_5 = arith.constant 0 : index
    %12 = vector.load %arg2[%c0_4, %c0_5] : memref<2x1024xf32, #tpu.memory_space<vmem>>, vector<2x1024xf32>
    tpu.vector_store %arg2[%c0_4, %c0_5], %11 {strides = array<i32>} : memref<2x1024xf32, #tpu.memory_space<vmem>>, vector<2x1024xf32>,
    return
  }
  func.func @transform_0(%arg0: i32) -> (i32, i32) {
    %c0_i32 = arith.constant 0 : i32
    %c0_i32_0 = arith.constant 0 : i32
    return %arg0, %c0_i32 : i32, i32
  }
  func.func @transform_1(%arg0: i32) -> (i32, i32) {
    %c0_i32 = arith.constant 0 : i32
    %c0_i32_0 = arith.constant 0 : i32
    return %arg0, %c0_i32 : i32, i32
  }
}

</mosaic_0001>

<bundles_post_ra>
// kernel: tpu_custom_call.1
= control target key start
LH: loop header
LB: loop body
LE: loop exit
PB: predicated region body
PF: predicated region fallthrough
CT: control target
= control target key end

     0   :  { %6 = vsyncpa [#allocation3], 0  ;;  %s158_s0 = inlined_call_operand.hbm [shape: f32[2,1024], index: 0, kind: input, shape index: {}]   ;;  %s159_s1 = inlined_call_operand.hbm [shape: f32[2,1024], index: 1, kind: output, shape index: {}]  }
   0x1   :  { %7 = vsyncpa [#allocation4], 0  ;;  %s122_s6 = smov [#allocation2]   ;;  %s74_s10 = scalar_lea.hbm %s158_s0, 256 }
   0x2   :  { %s14_s7 = sshll.u32 %s122_s6, 4  ;;  %p75_p0 = scmp.ne.s32.totalorder %s158_s0, %s74_s10  ;;  %s15_s7 = int_to_ptr.vmem [resolvable:$true] %s14_s7 }
   0x3   :  { %p78_p1 = scmp.lt.u32.totalorder %s74_s10, %s158_s0 }
   0x5   :  { %p80_p2 = pnand %p78_p1, %p75_p0 }
   0x7   :  { %83 = shalt.err (!%p80_p2)
}
   0x8   :  { %s84_s15 = scalar_lea.vmem %s15_s7, 256  ;;  %p89_p4 = scmp.lt.s32.totalorder %s15_s7, %s15_s7 }
   0x9   :  { %p85_p3 = scmp.ne.s32.totalorder %s15_s7, %s84_s15  ;;  %p90_p5 = scmp.lt.s32.totalorder %s84_s15, %s84_s15 }
   0xb   :  { %p91_p6 = por %p90_p5, %p89_p4 }
   0xd   :  { %p92_p7 = pnand %p91_p6, %p85_p3 }
   0xf   :  { %95 = shalt.err (!%p92_p7)
}
  0x10   :  { %17 = dma.hbm_to_vmem [thread:$0]  %s158_s0, 256, %s15_s7, [#allocation3]  }
  0x11   :  { %118 = dma.done.wait [#allocation3], 256  }
  0x12   :  { %119 = vsyncadd [#allocation3], 4294967040  ;;  %v21_v0 = vld [vmem:[#allocation2] sm:$0xff]  ;;  %v22_v1 = vld [vmem:[#allocation2 + $0x8] sm:$0xff]  ;;  %s123_s0 = smov [#allocation5]  }
  0x13   :  { %v23_v2 = vmul.f32 %v21_v0, %v21_v0  ;;  %v24_v3 = vmul.f32 %v22_v1, %v22_v1  ;;  %s57_s18 = sshll.u32 %s123_s0, 4  ;;  %s58_s18 = int_to_ptr.vmem [resolvable:$true] %s57_s18 }
  0x14   :  { %s96_s19 = scalar_lea.vmem %s58_s18, 256  ;;  %p101_p9 = scmp.lt.s32.totalorder %s58_s18, %s58_s18 }
  0x15   :  { %v25_v4 = vadd.f32 1.0, %v23_v2  ;;  %v26_v5 = vadd.f32 1.0, %v24_v3  ;;  %p97_p8 = scmp.ne.s32.totalorder %s58_s18, %s96_s19  ;;  %p102_p10 = scmp.lt.s32.totalorder %s96_s19, %s96_s19 }
  0x17   :  { %70 = vrsqrt.f32 %v25_v4  ;;  %vm29_vm0 = vcmp.eq.f32.partialorder %v25_v4, inf  ;;  %v32_v7 = vand.u32 2147483648, %v25_v4  ;;  %vm31_vm1 = vcmp.eq.f32.partialorder %v25_v4, 0.0  ;;  %p103_p11 = por %p102_p10, %p101_p9 }
  0x18   :  { %72 = vrsqrt.f32 %v26_v5  ;;  %vm36_vm2 = vcmp.eq.f32.partialorder %v26_v5, inf  ;;  %v39_v10 = vand.u32 2147483648, %v26_v5  ;;  %vm38_vm3 = vcmp.eq.f32.partialorder %v26_v5, 0.0 }
  0x19   :  { %p104_p12 = pnand %p103_p11, %p97_p8 }
  0x21   :  { %v71_v6 = vpop.eup %70 }
  0x22   :  { %v73_v8 = vpop.eup %72  ;;  %v28_v9 = vmul.f32 %v71_v6, %v25_v4 }
  0x23   :  { %v35_v11 = vmul.f32 %v73_v8, %v26_v5 }
  0x24   :  { %v30_v12 = vsel %vm29_vm0, %v25_v4, %v28_v9 }
  0x25   :  { %v33_v13 = vsel %vm31_vm1, %v32_v7, %v30_v12  ;;  %v37_v14 = vsel %vm36_vm2, %v26_v5, %v35_v11 }
  0x26   :  { %v66_v15 = vadd.f32 -1.0, %v33_v13  ;;  %v40_v16 = vsel %vm38_vm3, %v39_v10, %v37_v14 }
  0x27   :  { %v67_v17 = vadd.f32 -1.0, %v40_v16 }
  0x28   :  { %v43_v18 = vmul.f32 0.8181818, %v66_v15 }
  0x29   :  { %v44_v19 = vmul.f32 0.8181818, %v67_v17 }
  0x2a   :  { %v45_v20 = vadd.f32 %v43_v18, %v21_v0 }
  0x2b   :  { %v46_v21 = vadd.f32 %v44_v19, %v22_v1 }
  0x2c   :  { %v47_v22 = vmul.f32 0.55, %v45_v20 }
  0x2d   :  { %v48_v23 = vmul.f32 0.55, %v46_v21 }
  0x2e   :  { %49 = vst [vmem:[#allocation5] sm:$0xff] %v47_v22 }
  0x2f   :  { %50 = vst [vmem:[#allocation5 + $0x8] sm:$0xff] %v48_v23 }
  0x30   :  { %107 = shalt.err (!%p104_p12)
}
  0x31   :  { %s108_s22 = scalar_lea.hbm %s159_s1, 256 }
  0x32   :  { %p109_p13 = scmp.ne.s32.totalorder %s159_s1, %s108_s22  ;;  %p112_p0 = scmp.lt.u32.totalorder %s108_s22, %s159_s1 }
  0x34   :  { %p114_p1 = pnand %p112_p0, %p109_p13 }
  0x36   :  { %117 = shalt.err (!%p114_p1)
}
  0x37   :  { %60 = dma.vmem_to_hbm [thread:$0]  %s58_s18, 256, %s159_s1, [#allocation4]  }
  0x38   :  { %120 = dma.done.wait [#allocation4], 256  }
  0x39   :  { %121 = vsyncadd [#allocation4], 4294967040 }
  0x3a   :  { %64 = vsyncpa [#allocation3], 1 }
  0x3b   :  { %65 = vsyncpa [#allocation4], 1 }

</bundles_post_ra>
